<compile_context>
chip_gen: v5e
topology: v5e:2x2
jax: 0.10.0
libtpu: 0.0.40
codegen_flags: <defaults>
</compile_context>

<pallas_src>
import functools

import jax
import jax.numpy as jnp
import numpy as np
from jax.experimental import pallas as pl
from jax.experimental.pallas import tpu as pltpu


# -----------------------------------------------------------------------------
# Per-generation VMEM budget (v5e/v6e: 128 MiB phys -> ~96 MiB; v7x: 64 -> ~48).
# -----------------------------------------------------------------------------
def _vmem_limit_bytes():
    try:
        cap = int(pltpu.get_tpu_info().vmem_capacity_bytes)
    except Exception:
        cap = 64 << 20  # conservative fallback (safe on every generation)
    return int(min(cap * 3 // 4, 96 << 20))


# -----------------------------------------------------------------------------
# Encoder kernel: V-reduction for bow @ w1, then the tiny encoder tail.
# grid = (NB, NV); NV (reduction axis) last.
# -----------------------------------------------------------------------------
def _encoder_kernel(
    bow_ref,     # (TB, TV)  f32   bag-of-words tile
    w1_ref,      # (TV, 2H)        enc_linear1 weight tile (transposed)
    b1_ref,      # (1, 2H)   f32
    w2_ref,      # (2H, H)         enc_linear2 weight (transposed, resident)
    b2_ref,      # (1, H)    f32
    whead_ref,   # (H, 2Z)         [hidden_to_mu | hidden_to_logvar] fused
    bhead_ref,   # (1, 2Z)   f32
    eps_ref,     # (TB, Z)   f32   reparameterization noise
    z_ref,       # (TB, Z)   f32   OUT: latent sample
    kld_ref,     # (TB, 1)   f32   OUT: per-row KLD sum (mean over B in wrapper)
    mask_ref,    # (TB, TV)  f32   OUT: (bow > 0) mask
    acc_ref,     # (TB, 2H)  f32   scratch: running bow @ w1
    *, compute_dtype,
):
    v = pl.program_id(1)
    nv = pl.num_programs(1)
    n_z = eps_ref.shape[1]

    bow = bow_ref[...]
    # bow is resident anyway -> emit the mask here, saving a separate XLA pass
    # that would re-read tgt_bow from HBM.
    mask_ref[...] = (bow > 0).astype(mask_ref.dtype)

    @pl.when(v == 0)
    def _():
        acc_ref[...] = jnp.zeros_like(acc_ref)

    # Streamed partial matmul; f32 accumulation regardless of streaming dtype.
    acc_ref[...] += jnp.dot(
        bow.astype(compute_dtype), w1_ref[...],
        preferred_element_type=jnp.float32)

    @pl.when(v == nv - 1)
    def _():
        h1 = jnp.tanh(acc_ref[...] + b1_ref[...])
        h2 = jnp.tanh(
            jnp.dot(h1.astype(compute_dtype), w2_ref[...],
                    preferred_element_type=jnp.float32) + b2_ref[...])
        head = (
            jnp.dot(h2.astype(compute_dtype), whead_ref[...],
                    preferred_element_type=jnp.float32) + bhead_ref[...])
        # Z is tiny here; at larger non-128-aligned Z, pad each half to a lane
        # multiple to avoid masked slices.
        mu = head[:, :n_z]
        logvar = head[:, n_z:]

        std = jnp.exp(0.5 * logvar)          # reused: var = std*std == exp(logvar)
        z_ref[...] = (mu + eps_ref[...] * std).astype(z_ref.dtype)
        var = std * std
        kld_ref[...] = -0.5 * jnp.sum(
            logvar - mu * mu - var + 1.0, axis=1, keepdims=True)


# -----------------------------------------------------------------------------
# Decoder kernel: two-pass online softmax over V tiles.
# grid = (NB, 2, NV).  Phase 0: running max / sum-exp.  Phase 1: write output.
# -----------------------------------------------------------------------------
def _decoder_kernel(
    z_ref,       # (TB, Z)   f32
    wdec_ref,    # (Z, TV)         dec_linear1 weight tile (transposed)
    bdec_ref,    # (1, TV)   f32
    out_ref,     # (TB, TV)  f32   OUT: log(softmax(-dec(z)) + 1e-4)
    m_ref,       # (TB, 1)   f32   scratch: running row max
    l_ref,       # (TB, 1)   f32   scratch: running sum of exp
    *, compute_dtype,
):
    p = pl.program_id(1)
    v = pl.program_id(2)

    @pl.when((p == 0) & (v == 0))
    def _():
        m_ref[...] = jnp.full_like(m_ref, -jnp.inf)
        l_ref[...] = jnp.zeros_like(l_ref)

    # K = Z is tiny -> recomputing logits in phase 1 is cheaper than buffering
    # a (B, V) logits array.
    logits = -(
        jnp.dot(z_ref[...].astype(compute_dtype), wdec_ref[...],
                preferred_element_type=jnp.float32) + bdec_ref[...])

    @pl.when(p == 0)
    def _():
        m_prev = m_ref[...]
        m_new = jnp.maximum(m_prev, jnp.max(logits, axis=-1, keepdims=True))
        l_ref[...] = l_ref[...] * jnp.exp(m_prev - m_new) + jnp.sum(
            jnp.exp(logits - m_new), axis=-1, keepdims=True)
        m_ref[...] = m_new

    @pl.when(p == 1)
    def _():
        # lse = full-row log-sum-exp; softmax_i = exp(x_i - lse): no divide, no
        # reciprocal needed.
        lse = m_ref[...] + jnp.log(l_ref[...])
        out_ref[...] = jnp.log(jnp.exp(logits - lse) + 0.0001).astype(out_ref.dtype)


# -----------------------------------------------------------------------------
# Wrapper
# -----------------------------------------------------------------------------
@functools.partial(jax.jit, static_argnames=("tv", "tb"))
def vae_bow_forward(tgt_bow, eps, params, *, tv=128, tb=None):
    """Forward pass of autoenc_vae_bow.

    Args:
      tgt_bow: (B, V) float32 bag-of-words counts.
      eps:     (B, Z) float32 standard-normal noise (reparameterization trick).
      params:  dict from prepare_params() (fused head, streamed-weight dtype).
      tv:      vocabulary tile width (multiple of 128).
      tb:      batch tile height (defaults to B).
    Returns:
      dict with 'outputs' (B, V), 'kld' scalar, 'mask' (B, V).
    """
    B, V = tgt_bow.shape
    Z = eps.shape[1]
    H2 = params["w1"].shape[1]          # 2 * decoder_hidden_size
    H = params["w2"].shape[1]           # decoder_hidden_size
    compute_dtype = params["w1"].dtype  # f32 or bf16 weight streaming

    if tb is None:
        tb = B
    assert B % tb == 0 and V % tv == 0, "TODO(synk): pad ragged B / V"
    nb, nv = B // tb, V // tv

    vmem_limit = _vmem_limit_bytes()

    # ---------------- encoder: z, per-row kld, mask ----------------
    enc = pl.pallas_call(
        functools.partial(_encoder_kernel, compute_dtype=compute_dtype),
        out_shape=(
            jax.ShapeDtypeStruct((B, Z), jnp.float32),   # z
            jax.ShapeDtypeStruct((B, 1), jnp.float32),   # kld per row
            jax.ShapeDtypeStruct((B, V), jnp.float32),   # mask (lane-dense)
        ),
        grid_spec=pltpu.PrefetchScalarGridSpec(
            num_scalar_prefetch=0,
            grid=(nb, nv),
            in_specs=[
                pl.BlockSpec((tb, tv), lambda b, v: (b, v)),      # bow (streamed)
                pl.BlockSpec((tv, H2), lambda b, v: (v, 0)),      # w1  (streamed)
                pl.BlockSpec((1, H2), lambda b, v: (0, 0)),       # b1  (resident)
                pl.BlockSpec((H2, H), lambda b, v: (0, 0)),       # w2
                pl.BlockSpec((1, H), lambda b, v: (0, 0)),        # b2
                pl.BlockSpec((H, 2 * Z), lambda b, v: (0, 0)),    # whead
                pl.BlockSpec((1, 2 * Z), lambda b, v: (0, 0)),    # bhead
                pl.BlockSpec((tb, Z), lambda b, v: (b, 0)),       # eps
            ],
            out_specs=[
                pl.BlockSpec((tb, Z), lambda b, v: (b, 0)),       # z (last-tile write)
                pl.BlockSpec((tb, 1), lambda b, v: (b, 0)),       # kld rows
                pl.BlockSpec((tb, tv), lambda b, v: (b, v)),      # mask (every tile)
            ],
            scratch_shapes=[pltpu.VMEM((tb, H2), jnp.float32)],
        ),
        compiler_params=pltpu.CompilerParams(
            dimension_semantics=("parallel", "arbitrary"),
            vmem_limit_bytes=vmem_limit),
    )
    z, kld_rows, mask = enc(
        tgt_bow, params["w1"], params["b1"], params["w2"], params["b2"],
        params["whead"], params["bhead"], eps)

    # ---------------- decoder: log(softmax(-dec(z)) + 1e-4) ----------------
    dec = pl.pallas_call(
        functools.partial(_decoder_kernel, compute_dtype=compute_dtype),
        out_shape=jax.ShapeDtypeStruct((B, V), jnp.float32),
        grid_spec=pltpu.PrefetchScalarGridSpec(
            num_scalar_prefetch=0,
            grid=(nb, 2, nv),
            in_specs=[
                pl.BlockSpec((tb, Z), lambda b, p, v: (b, 0)),    # z (resident per b)
                pl.BlockSpec((Z, tv), lambda b, p, v: (0, v)),    # wdec (streamed, 2x)
                pl.BlockSpec((1, tv), lambda b, p, v: (0, v)),    # bdec (streamed, 2x)
            ],
            # Pinned to tile 0 during the stats phase (p=0), visited & written
            # exactly once per tile during the finalize phase (p=1).
            out_specs=pl.BlockSpec((tb, tv), lambda b, p, v: (b, p * v)),
            scratch_shapes=[pltpu.VMEM((tb, 1), jnp.float32),     # running max
                            pltpu.VMEM((tb, 1), jnp.float32)],    # running sum-exp
        ),
        compiler_params=pltpu.CompilerParams(
            dimension_semantics=("parallel", "arbitrary", "arbitrary"),
            vmem_limit_bytes=vmem_limit),
    )
    outputs = dec(z, params["wdec"], params["bdec"])

    kld = jnp.mean(kld_rows)   # mean over batch of the per-row KLD sums
    return {"outputs": outputs, "kld": kld, "mask": mask}


# -----------------------------------------------------------------------------
# One-time parameter preprocessing (hoisted out of the jitted forward):
# fuse the mu/logvar heads and cast the streamed weight matrices.
# -----------------------------------------------------------------------------
def prepare_params(raw, compute_dtype=jnp.float32):
    wd = compute_dtype
    whead = jnp.concatenate([raw["wmu"], raw["wlv"]], axis=1)   # (H, 2Z)
    bhead = jnp.concatenate([raw["bmu"], raw["blv"]], axis=1)   # (1, 2Z)
    return dict(
        w1=raw["w1"].astype(wd), b1=raw["b1"].astype(jnp.float32),
        w2=raw["w2"].astype(wd), b2=raw["b2"].astype(jnp.float32),
        whead=whead.astype(wd), bhead=bhead.astype(jnp.float32),
        wdec=raw["wdec"].astype(wd), bdec=raw["bdec"].astype(jnp.float32),
    )


# -----------------------------------------------------------------------------
# Deterministic parameter init (Linear: weight (out, in) -> stored as (in, out))
# -----------------------------------------------------------------------------
def init_params(key, vocab_size, hidden, n_z):
    def linear(k, fan_in, fan_out):
        kw, kb = jax.random.split(k)
        bound = 1.0 / np.sqrt(fan_in)
        w = jax.random.uniform(kw, (fan_in, fan_out), jnp.float32, -bound, bound)
        b = jax.random.uniform(kb, (1, fan_out), jnp.float32, -bound, bound)
        return w, b

    k1, k2, k3, k4, k5 = jax.random.split(key, 5)
    w1, b1 = linear(k1, vocab_size, 2 * hidden)          # enc_linear1
    w2, b2 = linear(k2, 2 * hidden, hidden)              # enc_linear2
    wmu, bmu = linear(k3, hidden, n_z)                   # hidden_to_mu
    wlv, blv = linear(k4, hidden, n_z)                   # hidden_to_logvar
    wdec, bdec = linear(k5, n_z, vocab_size)             # dec_linear1
    return dict(
        w1=w1, b1=b1, w2=w2, b2=b2,
        wmu=wmu, bmu=bmu, wlv=wlv, blv=blv,
        wdec=wdec, bdec=bdec,
    )


# -----------------------------------------------------------------------------
# Pure-JAX reference (mirrors the PyTorch forward)
# -----------------------------------------------------------------------------
def reference_forward(tgt_bow, eps, p):
    mask = (tgt_bow > 0).astype(jnp.float32)
    h1 = jnp.tanh(tgt_bow @ p["w1"] + p["b1"])
    h2 = jnp.tanh(h1 @ p["w2"] + p["b2"])
    mu = h2 @ p["wmu"] + p["bmu"]
    logvar = h2 @ p["wlv"] + p["blv"]
    z = mu + eps * jnp.exp(0.5 * logvar)
    kld = -0.5 * jnp.mean(jnp.sum(logvar - mu**2 - jnp.exp(logvar) + 1.0, axis=1))
    logits = -(z @ p["wdec"] + p["bdec"])
    out = jnp.log(jax.nn.softmax(logits, axis=-1) + 0.0001)
    return {"outputs": out, "kld": kld, "mask": mask}


# -----------------------------------------------------------------------------
# Main
# -----------------------------------------------------------------------------
if __name__ == "__main__":
    # Small shapes consistent with the module:
    #   vocab_size = 256, decoder_hidden_size = 32, n_z = 16, batch = 8
    B, V, H, Z = 8, 256, 32, 16
    TV = 128   # 2 vocabulary tiles -> exercises the streamed reduction + online softmax

    key = jax.random.PRNGKey(0)
    k_bow, k_eps, k_sparse = jax.random.split(key, 3)

    # Synthetic sparse bag-of-words counts (non-negative integers as floats).
    counts = jax.random.randint(k_bow, (B, V), 0, 4)
    sparsify = jax.random.bernoulli(k_sparse, 0.2, (B, V))
    tgt_bow = (counts * sparsify).astype(jnp.float32)

    # Standard-normal noise for the reparameterization trick (torch.randn).
    eps = jax.random.normal(k_eps, (B, Z), jnp.float32)

    raw_params = init_params(jax.random.PRNGKey(42), V, H, Z)
    ref = reference_forward(tgt_bow, eps, raw_params)

    # --- f32 weight streaming: strict check against the f32 reference ---
    params_f32 = prepare_params(raw_params, jnp.float32)
    out = vae_bow_forward(tgt_bow, eps, params_f32, tv=TV)
    jax.block_until_ready(out)
    np.testing.assert_allclose(np.asarray(out["outputs"]), np.asarray(ref["outputs"]),
                               rtol=1e-4, atol=1e-4)
    np.testing.assert_allclose(np.asarray(out["kld"]), np.asarray(ref["kld"]),
                               rtol=1e-4, atol=1e-4)
    np.testing.assert_allclose(np.asarray(out["mask"]), np.asarray(ref["mask"]),
                               rtol=0, atol=0)

    # --- bf16 weight streaming (halves dominant HBM streams); loose tolerance ---
    params_bf16 = prepare_params(raw_params, jnp.bfloat16)
    out_bf16 = vae_bow_forward(tgt_bow, eps, params_bf16, tv=TV)
    jax.block_until_ready(out_bf16)
    np.testing.assert_allclose(np.asarray(out_bf16["outputs"]), np.asarray(ref["outputs"]),
                               rtol=1e-1, atol=1e-1)
    np.testing.assert_allclose(np.asarray(out_bf16["kld"]), np.asarray(ref["kld"]),
                               rtol=1e-1, atol=1e-1)
    np.testing.assert_allclose(np.asarray(out_bf16["mask"]), np.asarray(ref["mask"]),
                               rtol=0, atol=0)

    print("KERNEL_OK")
</pallas_src>

<mosaic_0001>
module attributes {stable_mosaic.version = 11 : i64} {
  func.func @_encoder_kernel(%arg0: i32, %arg1: i32, %arg2: memref<8x128xf32, #tpu.memory_space<vmem>>, %arg3: memref<128x64xf32, #tpu.memory_space<vmem>>, %arg4: memref<1x64xf32, #tpu.memory_space<vmem>>, %arg5: memref<64x32xf32, #tpu.memory_space<vmem>>, %arg6: memref<1x32xf32, #tpu.memory_space<vmem>>, %arg7: memref<32x32xf32, #tpu.memory_space<vmem>>, %arg8: memref<1x32xf32, #tpu.memory_space<vmem>>, %arg9: memref<8x16xf32, #tpu.memory_space<vmem>>, %arg10: memref<8x16xf32, #tpu.memory_space<vmem>>, %arg11: memref<8x1xf32, #tpu.memory_space<vmem>>, %arg12: memref<8x128xf32, #tpu.memory_space<vmem>>, %arg13: memref<8x64xf32, #tpu.memory_space<vmem>>) attributes {dimension_semantics = [#tpu.dimension_semantics<parallel>, #tpu.dimension_semantics<arbitrary>], iteration_bounds = array<i64: 1, 2>, scalar_prefetch = 0 : i64, scratch_operands = 1 : i64, tpu.core_type = #tpu.core_type<tc>, window_params = [{transform_indices = @transform_0, window_bounds = array<i64: 8, 128>}, {transform_indices = @transform_1, window_bounds = array<i64: 128, 64>}, {pipeline_mode = #tpu.pipeline_mode<synchronous>, transform_indices = @transform_2, window_bounds = array<i64: 1, 64>}, {pipeline_mode = #tpu.pipeline_mode<synchronous>, transform_indices = @transform_3, window_bounds = array<i64: 64, 32>}, {pipeline_mode = #tpu.pipeline_mode<synchronous>, transform_indices = @transform_4, window_bounds = array<i64: 1, 32>}, {pipeline_mode = #tpu.pipeline_mode<synchronous>, transform_indices = @transform_5, window_bounds = array<i64: 32, 32>}, {pipeline_mode = #tpu.pipeline_mode<synchronous>, transform_indices = @transform_6, window_bounds = array<i64: 1, 32>}, {transform_indices = @transform_7, window_bounds = array<i64: 8, 16>}, {transform_indices = @transform_8, window_bounds = array<i64: 8, 16>}, {transform_indices = @transform_9, window_bounds = array<i64: 8, 1>}, {transform_indices = @transform_10, window_bounds = array<i64: 8, 128>}]} {
    %c0 = arith.constant 0 : index
    %c0_0 = arith.constant 0 : index
    %0 = vector.load %arg2[%c0, %c0_0] : memref<8x128xf32, #tpu.memory_space<vmem>>, vector<8x128xf32>
    %cst = arith.constant 0.000000e+00 : f32
    %1 = vector.broadcast %cst : f32 to vector<8x128xf32>
    %2 = arith.cmpf ogt, %0, %1 : vector<8x128xf32>
    %3 = arith.extui %2 : vector<8x128xi1> to vector<8x128xi32>
    %4 = arith.sitofp %3 : vector<8x128xi32> to vector<8x128xf32>
    %c0_1 = arith.constant 0 : index
    %c0_2 = arith.constant 0 : index
    %5 = vector.load %arg12[%c0_1, %c0_2] : memref<8x128xf32, #tpu.memory_space<vmem>>, vector<8x128xf32>
    tpu.vector_store %arg12[%c0_1, %c0_2], %4 {strides = array<i32>} : memref<8x128xf32, #tpu.memory_space<vmem>>, vector<8x128xf32>,
    %c0_i32 = arith.constant 0 : i32
    %6 = arith.cmpi eq, %arg1, %c0_i32 : i32
    %7 = arith.extui %6 : i1 to i32
    %c0_i32_3 = arith.constant 0 : i32
    %8 = arith.cmpi ne, %7, %c0_i32_3 : i32
    scf.if %8 {
      %cst_12 = arith.constant 0.000000e+00 : f32
      %17 = vector.broadcast %cst_12 : f32 to vector<8x64xf32>
      %c0_13 = arith.constant 0 : index
      %c0_14 = arith.constant 0 : index
      %18 = vector.load %arg13[%c0_13, %c0_14] : memref<8x64xf32, #tpu.memory_space<vmem>>, vector<8x64xf32>
      tpu.vector_store %arg13[%c0_13, %c0_14], %17 {strides = array<i32>} : memref<8x64xf32, #tpu.memory_space<vmem>>, vector<8x64xf32>,
    } else {
    }
    %c0_4 = arith.constant 0 : index
    %c0_5 = arith.constant 0 : index
    %9 = vector.load %arg13[%c0_4, %c0_5] : memref<8x64xf32, #tpu.memory_space<vmem>>, vector<8x64xf32>
    %c0_6 = arith.constant 0 : index
    %c0_7 = arith.constant 0 : index
    %10 = vector.load %arg3[%c0_6, %c0_7] : memref<128x64xf32, #tpu.memory_space<vmem>>, vector<128x64xf32>
    %cst_8 = arith.constant dense<0.000000e+00> : vector<8x64xf32>
    %11 = tpu.matmul %0, %10, %cst_8 {dimension_numbers = #tpu.dot_dimension_numbers<[1], [0], [0], [1], [0, 0, 1, 1], [], []>} : vector<8x128xf32>, vector<128x64xf32>, vector<8x64xf32> -> vector<8x64xf32>
    %12 = arith.addf %9, %11 : vector<8x64xf32>
    %c0_9 = arith.constant 0 : index
    %c0_10 = arith.constant 0 : index
    %13 = vector.load %arg13[%c0_9, %c0_10] : memref<8x64xf32, #tpu.memory_space<vmem>>, vector<8x64xf32>
    tpu.vector_store %arg13[%c0_9, %c0_10], %12 {strides = array<i32>} : memref<8x64xf32, #tpu.memory_space<vmem>>, vector<8x64xf32>,
    %c1_i32 = arith.constant 1 : i32
    %14 = arith.cmpi eq, %arg1, %c1_i32 : i32
    %15 = arith.extui %14 : i1 to i32
    %c0_i32_11 = arith.constant 0 : i32
    %16 = arith.cmpi ne, %15, %c0_i32_11 : i32
    scf.if %16 {
      %c0_12 = arith.constant 0 : index
      %c0_13 = arith.constant 0 : index
      %17 = vector.load %arg13[%c0_12, %c0_13] : memref<8x64xf32, #tpu.memory_space<vmem>>, vector<8x64xf32>
      %c0_14 = arith.constant 0 : index
      %c0_15 = arith.constant 0 : index
      %18 = vector.load %arg4[%c0_14, %c0_15] : memref<1x64xf32, #tpu.memory_space<vmem>>, vector<1x64xf32>
      %19 = vector.broadcast %18 : vector<1x64xf32> to vector<8x64xf32>
      %20 = arith.addf %17, %19 : vector<8x64xf32>
      %21 = math.tanh %20 : vector<8x64xf32>
      %c0_16 = arith.constant 0 : index
      %c0_17 = arith.constant 0 : index
      %22 = vector.load %arg5[%c0_16, %c0_17] : memref<64x32xf32, #tpu.memory_space<vmem>>, vector<64x32xf32>
      %cst_18 = arith.constant dense<0.000000e+00> : vector<8x32xf32>
      %23 = tpu.matmul %21, %22, %cst_18 {dimension_numbers = #tpu.dot_dimension_numbers<[1], [0], [0], [1], [0, 0, 1, 1], [], []>} : vector<8x64xf32>, vector<64x32xf32>, vector<8x32xf32> -> vector<8x32xf32>
      %c0_19 = arith.constant 0 : index
      %c0_20 = arith.constant 0 : index
      %24 = vector.load %arg6[%c0_19, %c0_20] : memref<1x32xf32, #tpu.memory_space<vmem>>, vector<1x32xf32>
      %25 = vector.broadcast %24 : vector<1x32xf32> to vector<8x32xf32>
      %26 = arith.addf %23, %25 : vector<8x32xf32>
      %27 = math.tanh %26 : vector<8x32xf32>
      %c0_21 = arith.constant 0 : index
      %c0_22 = arith.constant 0 : index
      %28 = vector.load %arg7[%c0_21, %c0_22] : memref<32x32xf32, #tpu.memory_space<vmem>>, vector<32x32xf32>
      %cst_23 = arith.constant dense<0.000000e+00> : vector<8x32xf32>
      %29 = tpu.matmul %27, %28, %cst_23 {dimension_numbers = #tpu.dot_dimension_numbers<[1], [0], [0], [1], [0, 0, 1, 1], [], []>} : vector<8x32xf32>, vector<32x32xf32>, vector<8x32xf32> -> vector<8x32xf32>
      %c0_24 = arith.constant 0 : index
      %c0_25 = arith.constant 0 : index
      %30 = vector.load %arg8[%c0_24, %c0_25] : memref<1x32xf32, #tpu.memory_space<vmem>>, vector<1x32xf32>
      %31 = vector.broadcast %30 : vector<1x32xf32> to vector<8x32xf32>
      %32 = arith.addf %29, %31 : vector<8x32xf32>
      %33 = vector.extract_strided_slice %32 {offsets = [0, 0], sizes = [8, 16], strides = [1, 1]} : vector<8x32xf32> to vector<8x16xf32>
      %34 = vector.extract_strided_slice %32 {offsets = [0, 16], sizes = [8, 16], strides = [1, 1]} : vector<8x32xf32> to vector<8x16xf32>
      %cst_26 = arith.constant 5.000000e-01 : f32
      %35 = vector.broadcast %cst_26 : f32 to vector<8x16xf32>
      %36 = arith.mulf %35, %34 : vector<8x16xf32>
      %37 = math.exp %36 : vector<8x16xf32>
      %c0_27 = arith.constant 0 : index
      %c0_28 = arith.constant 0 : index
      %38 = vector.load %arg9[%c0_27, %c0_28] : memref<8x16xf32, #tpu.memory_space<vmem>>, vector<8x16xf32>
      %39 = arith.mulf %38, %37 : vector<8x16xf32>
      %40 = arith.addf %33, %39 : vector<8x16xf32>
      %c0_29 = arith.constant 0 : index
      %c0_30 = arith.constant 0 : index
      %41 = vector.load %arg10[%c0_29, %c0_30] : memref<8x16xf32, #tpu.memory_space<vmem>>, vector<8x16xf32>
      tpu.vector_store %arg10[%c0_29, %c0_30], %40 {strides = array<i32>} : memref<8x16xf32, #tpu.memory_space<vmem>>, vector<8x16xf32>,
      %42 = arith.mulf %37, %37 : vector<8x16xf32>
      %43 = arith.mulf %33, %33 : vector<8x16xf32>
      %44 = arith.subf %34, %43 : vector<8x16xf32>
      %45 = arith.subf %44, %42 : vector<8x16xf32>
      %cst_31 = arith.constant 1.000000e+00 : f32
      %46 = vector.broadcast %cst_31 : f32 to vector<8x16xf32>
      %47 = arith.addf %45, %46 : vector<8x16xf32>
      %cst_32 = arith.constant dense<0.000000e+00> : vector<8xf32>
      %48 = vector.multi_reduction <add>, %47, %cst_32 [1] : vector<8x16xf32> to vector<8xf32>
      %49 = vector.shape_cast %48 : vector<8xf32> to vector<8x1xf32>
      %cst_33 = arith.constant -5.000000e-01 : f32
      %50 = vector.broadcast %cst_33 : f32 to vector<8x1xf32>
      %51 = arith.mulf %50, %49 : vector<8x1xf32>
      %c0_34 = arith.constant 0 : index
      %c0_35 = arith.constant 0 : index
      %52 = vector.load %arg11[%c0_34, %c0_35] : memref<8x1xf32, #tpu.memory_space<vmem>>, vector<8x1xf32>
      tpu.vector_store %arg11[%c0_34, %c0_35], %51 {strides = array<i32>} : memref<8x1xf32, #tpu.memory_space<vmem>>, vector<8x1xf32>,
    } else {
    }
    return
  }
  func.func @transform_0(%arg0: i32, %arg1: i32) -> (i32, i32) {
    %c0_i32 = arith.constant 0 : i32
    return %arg0, %arg1 : i32, i32
  }
  func.func @transform_1(%arg0: i32, %arg1: i32) -> (i32, i32) {
    %c0_i32 = arith.constant 0 : i32
    %c0_i32_0 = arith.constant 0 : i32
    return %arg1, %c0_i32 : i32, i32
  }
  func.func @transform_2(%arg0: i32, %arg1: i32) -> (i32, i32) {
    %c0_i32 = arith.constant 0 : i32
    %c0_i32_0 = arith.constant 0 : i32
    %c0_i32_1 = arith.constant 0 : i32
    return %c0_i32, %c0_i32_0 : i32, i32
  }
  func.func @transform_3(%arg0: i32, %arg1: i32) -> (i32, i32) {
    %c0_i32 = arith.constant 0 : i32
    %c0_i32_0 = arith.constant 0 : i32
    %c0_i32_1 = arith.constant 0 : i32
    return %c0_i32, %c0_i32_0 : i32, i32
  }
  func.func @transform_4(%arg0: i32, %arg1: i32) -> (i32, i32) {
    %c0_i32 = arith.constant 0 : i32
    %c0_i32_0 = arith.constant 0 : i32
    %c0_i32_1 = arith.constant 0 : i32
    return %c0_i32, %c0_i32_0 : i32, i32
  }
  func.func @transform_5(%arg0: i32, %arg1: i32) -> (i32, i32) {
    %c0_i32 = arith.constant 0 : i32
    %c0_i32_0 = arith.constant 0 : i32
    %c0_i32_1 = arith.constant 0 : i32
    return %c0_i32, %c0_i32_0 : i32, i32
  }
  func.func @transform_6(%arg0: i32, %arg1: i32) -> (i32, i32) {
    %c0_i32 = arith.constant 0 : i32
    %c0_i32_0 = arith.constant 0 : i32
    %c0_i32_1 = arith.constant 0 : i32
    return %c0_i32, %c0_i32_0 : i32, i32
  }
  func.func @transform_7(%arg0: i32, %arg1: i32) -> (i32, i32) {
    %c0_i32 = arith.constant 0 : i32
    %c0_i32_0 = arith.constant 0 : i32
    return %arg0, %c0_i32 : i32, i32
  }
  func.func @transform_8(%arg0: i32, %arg1: i32) -> (i32, i32) {
    %c0_i32 = arith.constant 0 : i32
    %c0_i32_0 = arith.constant 0 : i32
    return %arg0, %c0_i32 : i32, i32
  }
  func.func @transform_9(%arg0: i32, %arg1: i32) -> (i32, i32) {
    %c0_i32 = arith.constant 0 : i32
    %c0_i32_0 = arith.constant 0 : i32
    return %arg0, %c0_i32 : i32, i32
  }
  func.func @transform_10(%arg0: i32, %arg1: i32) -> (i32, i32) {
    %c0_i32 = arith.constant 0 : i32
    return %arg0, %arg1 : i32, i32
  }
}

module attributes {stable_mosaic.version = 11 : i64} {
  func.func @_decoder_kernel(%arg0: i32, %arg1: i32, %arg2: i32, %arg3: memref<8x16xf32, #tpu.memory_space<vmem>>, %arg4: memref<16x128xf32, #tpu.memory_space<vmem>>, %arg5: memref<1x128xf32, #tpu.memory_space<vmem>>, %arg6: memref<8x128xf32, #tpu.memory_space<vmem>>, %arg7: memref<8x1xf32, #tpu.memory_space<vmem>>, %arg8: memref<8x1xf32, #tpu.memory_space<vmem>>) attributes {dimension_semantics = [#tpu.dimension_semantics<parallel>, #tpu.dimension_semantics<arbitrary>, #tpu.dimension_semantics<arbitrary>], iteration_bounds = array<i64: 1, 2, 2>, scalar_prefetch = 0 : i64, scratch_operands = 2 : i64, tpu.core_type = #tpu.core_type<tc>, window_params = [{transform_indices = @transform_0, window_bounds = array<i64: 8, 16>}, {transform_indices = @transform_1, window_bounds = array<i64: 16, 128>}, {transform_indices = @transform_2, window_bounds = array<i64: 1, 128>}, {transform_indices = @transform_3, window_bounds = array<i64: 8, 128>}]} {
    %c0_i32 = arith.constant 0 : i32
    %0 = arith.cmpi eq, %arg1, %c0_i32 : i32
    %c0_i32_0 = arith.constant 0 : i32
    %1 = arith.cmpi eq, %arg2, %c0_i32_0 : i32
    %2 = arith.andi %0, %1 : i1
    %3 = arith.extui %2 : i1 to i32
    %c0_i32_1 = arith.constant 0 : i32
    %4 = arith.cmpi ne, %3, %c0_i32_1 : i32
    scf.if %4 {
      %cst_11 = arith.constant 0xFF800000 : f32
      %19 = vector.broadcast %cst_11 : f32 to vector<8x1xf32>
      %c0_12 = arith.constant 0 : index
      %c0_13 = arith.constant 0 : index
      %20 = vector.load %arg7[%c0_12, %c0_13] : memref<8x1xf32, #tpu.memory_space<vmem>>, vector<8x1xf32>
      tpu.vector_store %arg7[%c0_12, %c0_13], %19 {strides = array<i32>} : memref<8x1xf32, #tpu.memory_space<vmem>>, vector<8x1xf32>,
      %cst_14 = arith.constant 0.000000e+00 : f32
      %21 = vector.broadcast %cst_14 : f32 to vector<8x1xf32>
      %c0_15 = arith.constant 0 : index
      %c0_16 = arith.constant 0 : index
      %22 = vector.load %arg8[%c0_15, %c0_16] : memref<8x1xf32, #tpu.memory_space<vmem>>, vector<8x1xf32>
      tpu.vector_store %arg8[%c0_15, %c0_16], %21 {strides = array<i32>} : memref<8x1xf32, #tpu.memory_space<vmem>>, vector<8x1xf32>,
    } else {
    }
    %c0 = arith.constant 0 : index
    %c0_2 = arith.constant 0 : index
    %5 = vector.load %arg3[%c0, %c0_2] : memref<8x16xf32, #tpu.memory_space<vmem>>, vector<8x16xf32>
    %c0_3 = arith.constant 0 : index
    %c0_4 = arith.constant 0 : index
    %6 = vector.load %arg4[%c0_3, %c0_4] : memref<16x128xf32, #tpu.memory_space<vmem>>, vector<16x128xf32>
    %cst = arith.constant dense<0.000000e+00> : vector<8x128xf32>
    %7 = tpu.matmul %5, %6, %cst {dimension_numbers = #tpu.dot_dimension_numbers<[1], [0], [0], [1], [0, 0, 1, 1], [], []>} : vector<8x16xf32>, vector<16x128xf32>, vector<8x128xf32> -> vector<8x128xf32>
    %c0_5 = arith.constant 0 : index
    %c0_6 = arith.constant 0 : index
    %8 = vector.load %arg5[%c0_5, %c0_6] : memref<1x128xf32, #tpu.memory_space<vmem>>, vector<1x128xf32>
    %9 = vector.broadcast %8 : vector<1x128xf32> to vector<8x128xf32>
    %10 = arith.addf %7, %9 : vector<8x128xf32>
    %cst_7 = arith.constant 0.000000e+00 : f32
    %11 = vector.broadcast %cst_7 : f32 to vector<8x128xf32>
    %12 = arith.subf %11, %10 : vector<8x128xf32>
    %c0_i32_8 = arith.constant 0 : i32
    %13 = arith.cmpi eq, %arg1, %c0_i32_8 : i32
    %14 = arith.extui %13 : i1 to i32
    %c0_i32_9 = arith.constant 0 : i32
    %15 = arith.cmpi ne, %14, %c0_i32_9 : i32
    scf.if %15 {
      %c0_11 = arith.constant 0 : index
      %c0_12 = arith.constant 0 : index
      %19 = vector.load %arg7[%c0_11, %c0_12] : memref<8x1xf32, #tpu.memory_space<vmem>>, vector<8x1xf32>
      %cst_13 = arith.constant dense<0xFF800000> : vector<8xf32>
      %20 = vector.multi_reduction <maximumf>, %12, %cst_13 [1] : vector<8x128xf32> to vector<8xf32>
      %21 = vector.shape_cast %20 : vector<8xf32> to vector<8x1xf32>
      %22 = arith.maximumf %19, %21 : vector<8x1xf32>
      %c0_14 = arith.constant 0 : index
      %c0_15 = arith.constant 0 : index
      %23 = vector.load %arg8[%c0_14, %c0_15] : memref<8x1xf32, #tpu.memory_space<vmem>>, vector<8x1xf32>
      %24 = arith.subf %19, %22 : vector<8x1xf32>
      %25 = math.exp %24 : vector<8x1xf32>
      %26 = arith.mulf %23, %25 : vector<8x1xf32>
      %27 = vector.broadcast %22 : vector<8x1xf32> to vector<8x128xf32>
      %28 = arith.subf %12, %27 : vector<8x128xf32>
      %29 = math.exp %28 : vector<8x128xf32>
      %cst_16 = arith.constant dense<0.000000e+00> : vector<8xf32>
      %30 = vector.multi_reduction <add>, %29, %cst_16 [1] : vector<8x128xf32> to vector<8xf32>
      %31 = vector.shape_cast %30 : vector<8xf32> to vector<8x1xf32>
      %32 = arith.addf %26, %31 : vector<8x1xf32>
      %c0_17 = arith.constant 0 : index
      %c0_18 = arith.constant 0 : index
      %33 = vector.load %arg8[%c0_17, %c0_18] : memref<8x1xf32, #tpu.memory_space<vmem>>, vector<8x1xf32>
      tpu.vector_store %arg8[%c0_17, %c0_18], %32 {strides = array<i32>} : memref<8x1xf32, #tpu.memory_space<vmem>>, vector<8x1xf32>,
      %c0_19 = arith.constant 0 : index
      %c0_20 = arith.constant 0 : index
      %34 = vector.load %arg7[%c0_19, %c0_20] : memref<8x1xf32, #tpu.memory_space<vmem>>, vector<8x1xf32>
      tpu.vector_store %arg7[%c0_19, %c0_20], %22 {strides = array<i32>} : memref<8x1xf32, #tpu.memory_space<vmem>>, vector<8x1xf32>,
    } else {
    }
    %c1_i32 = arith.constant 1 : i32
    %16 = arith.cmpi eq, %arg1, %c1_i32 : i32
    %17 = arith.extui %16 : i1 to i32
    %c0_i32_10 = arith.constant 0 : i32
    %18 = arith.cmpi ne, %17, %c0_i32_10 : i32
    scf.if %18 {
      %c0_11 = arith.constant 0 : index
      %c0_12 = arith.constant 0 : index
      %19 = vector.load %arg7[%c0_11, %c0_12] : memref<8x1xf32, #tpu.memory_space<vmem>>, vector<8x1xf32>
      %c0_13 = arith.constant 0 : index
      %c0_14 = arith.constant 0 : index
      %20 = vector.load %arg8[%c0_13, %c0_14] : memref<8x1xf32, #tpu.memory_space<vmem>>, vector<8x1xf32>
      %21 = math.log %20 : vector<8x1xf32>
      %22 = arith.addf %19, %21 : vector<8x1xf32>
      %23 = vector.broadcast %22 : vector<8x1xf32> to vector<8x128xf32>
      %24 = arith.subf %12, %23 : vector<8x128xf32>
      %25 = math.exp %24 : vector<8x128xf32>
      %cst_15 = arith.constant 9.99999974E-5 : f32
      %26 = vector.broadcast %cst_15 : f32 to vector<8x128xf32>
      %27 = arith.addf %25, %26 : vector<8x128xf32>
      %28 = math.log %27 : vector<8x128xf32>
      %c0_16 = arith.constant 0 : index
      %c0_17 = arith.constant 0 : index
      %29 = vector.load %arg6[%c0_16, %c0_17] : memref<8x128xf32, #tpu.memory_space<vmem>>, vector<8x128xf32>
      tpu.vector_store %arg6[%c0_16, %c0_17], %28 {strides = array<i32>} : memref<8x128xf32, #tpu.memory_space<vmem>>, vector<8x128xf32>,
    } else {
    }
    return
  }
  func.func @transform_0(%arg0: i32, %arg1: i32, %arg2: i32) -> (i32, i32) {
    %c0_i32 = arith.constant 0 : i32
    %c0_i32_0 = arith.constant 0 : i32
    return %arg0, %c0_i32 : i32, i32
  }
  func.func @transform_1(%arg0: i32, %arg1: i32, %arg2: i32) -> (i32, i32) {
    %c0_i32 = arith.constant 0 : i32
    %c0_i32_0 = arith.constant 0 : i32
    return %c0_i32, %arg2 : i32, i32
  }
  func.func @transform_2(%arg0: i32, %arg1: i32, %arg2: i32) -> (i32, i32) {
    %c0_i32 = arith.constant 0 : i32
    %c0_i32_0 = arith.constant 0 : i32
    return %c0_i32, %arg2 : i32, i32
  }
  func.func @transform_3(%arg0: i32, %arg1: i32, %arg2: i32) -> (i32, i32) {
    %0 = arith.muli %arg1, %arg2 : i32
    %c0_i32 = arith.constant 0 : i32
    return %arg0, %0 : i32, i32
  }
}

</mosaic_0001>

<bundles_post_ra>
// kernel: vae_bow_forward.3
= control target key start
LH: loop header
LB: loop body
LE: loop exit
PB: predicated region body
PF: predicated region fallthrough
CT: control target
= control target key end

     0   :  { %s910_s0 = inlined_call_operand.vmem [shape: f32[8,16], index: 0, kind: input, shape index: {}]   ;;  %s911_s1 = inlined_call_operand.vmem [shape: f32[16,256], index: 1, kind: input, shape index: {}]   ;;  %s912_s2 = inlined_call_operand.vmem [shape: f32[1,256], index: 2, kind: input, shape index: {}]   ;;  %s913_s3 = inlined_call_operand.hbm [shape: f32[8,256], index: 3, kind: output, shape index: {}]  }
   0x1   :  { %914 = sst [smem:[#allocation8_spill]] %s910_s0 }
   0x2   :  { %8 = vsyncpa [#allocation6], 0 }
   0x3   :  { %10 = vsyncpa [#allocation6 + $0x1], 0  ;;  %s732_s12 = smov 0   ;;  %s734_s13 = smov 0  }
   0x4   :  { %s736_s14 = smov 0   ;;  %s738_s15 = smov 0  }
   0x5   :  { %s740_s16 = smov 0   ;;  %s742_s17 = smov 0  }
   0x6   :  { %s744_s18 = smov 0   ;;  %s746_s19 = smov 0  }
   0x7   :  { %s748_s20 = smov 0   ;;  %s750_s21 = smov 0  }
   0x8 LB: > { %s475_s22 = sadd.s32 4294967295, %s706_s21   ;;  %s476_s23 = sadd.s32 4294967294, %s706_s21   ;;  %s706_s21 = sphi %s750_s21, %s16_s21   ;;  %s702_s20 = sphi %s748_s20, %s927_s20   ;;  %s698_s19 = sphi %s746_s19, %s926_s19   ;;  %s694_s18 = sphi %s744_s18, %s925_s18   ;;  %s690_s17 = sphi %s742_s17, %s924_s17   ;;  %s686_s16 = sphi %s740_s16, %s923_s16   ;;  %s682_s15 = sphi %s738_s15, %s922_s15   ;;  %s678_s14 = sphi %s736_s14, %s921_s14   ;;  %s674_s13 = sphi %s734_s13, %s920_s13   ;;  %s670_s12 = sphi %s732_s12, %s919_s12  }
   0x9   : > { %s28_s24 = sadd.s32 1, %s698_s19  ;;  %s31_s25 = sadd.s32 1, %s702_s20 }
   0xa   : > { %p29_p0 = scmp.ge.s32.totalorder %s28_s24, 2  ;;  %s68_s26 = sadd.s32 1, %s686_s16 }
   0xb   : > { %p75_p1 = scmp.ne.s32.totalorder %s686_s16, %s682_s15  ;;  %p76_p2 = scmp.eq.s32.totalorder %s706_s21, 0 }
   0xc   : > { %s929_s24 = smov (%p29_p0, %s28_s24), 0  ;;  %s931_s25 = smov (!%p29_p0, %s31_s25), %s702_s20 }
   0xd   : > { %s65_s27 = ssub.s32 %s698_s19, %s929_s24  ;;  %p795_p3 = por %p76_p2, %p75_p1 }
   0xe   : > { %p33_p4 = scmp.ge.s32.totalorder %s931_s25, 2  ;;  %p66_p5 = scmp.eq.s32.totalorder %s65_s27, 0 }
   0xf   : > { %s117_s29 = smul.u32 %s698_s19, %s702_s20  ;;  %s124_s30 = sadd.s32 1, %s678_s14 }
  0x10   : > { %s933_s25 = smov (%p33_p4, %s931_s25), 0  ;;  %p134_p6 = scmp.ne.s32.totalorder %s678_s14, %s674_s13 }
  0x11   : > { %s805_s4 = scalar_select %p66_p5, %s686_s16, %s68_s26  }
  0x12   : > { %s118_s5 = smul.u32 %s933_s25, %s929_s24  ;;  %p135_p7 = scmp.eq.s32.totalorder %s475_s22, 3 }
  0x13   : > { %p140_p8 = scmp.ne.s32.totalorder %s674_s13, %s670_s12  ;;  %p141_p9 = scmp.eq.s32.totalorder %s476_s23, 3 }
  0x14   : > { %s120_s6 = ssub.s32 %s117_s29, %s118_s5  ;;  %p813_p11 = por %p135_p7, %p134_p6 }
  0x15   : > { %p122_p10 = scmp.eq.s32.totalorder %s120_s6, 0  ;;  %p817_p12 = por %p141_p9, %p140_p8 }
  0x16   : > { %p479_p13 = scmp.ge.s32.totalorder %s706_s21, 4 }
  0x17   : > { %s822_s9 = scalar_select %p122_p10, %s678_s14, %s124_s30  }
  0x18   : > { %164 = sbr.rel (%p479_p13) target bundleno = 35 (0x23), region = 20 }
  0x1d   : > { %167 = sbr.rel (!%p795_p3) target bundleno = 35 (0x23), region = 24  ;;  %s169_s10 = sand.u32 (%p795_p3), 1, %s686_s16  }
  0x1e   : > { %s481_s11 = sshll.u32 (%p795_p3), %s698_s19, 3  ;;  %s480_s22 = sshll.u32 (%p795_p3), %s169_s10, 4 }
  0x1f   : > { %s173_s27 = scalar_lea.vmem (%p795_p3), %s911_s1, %s481_s11  ;;  %s171_s29 = scalar_lea.vmem (%p795_p3), [#allocation4], %s480_s22 }
  0x20   : > { %v204_v0 = vld [vmem:[%s173_s27] sm:$0xff] (%p795_p3)  ;;  %v206_v1 = vld [vmem:[%s173_s27 + $0x10] sm:$0xff] (%p795_p3) }
  0x21   : > { %205 = vst [vmem:[%s171_s29] sm:$0xff] (%p795_p3), %v204_v0 }
  0x22   : > { %207 = vst [vmem:[%s171_s29 + $0x8] sm:$0xff] %v206_v1 }
  0x23 PF: > { %p482_p0 = scmp.ge.s32.totalorder %s706_s21, 1  ;;  %p218_p1 = scmp.lt.s32.totalorder %s706_s21, 5 }
  0x25   : > { %p219_p2 = pnand %p482_p0, %p218_p1 }
  0x26   : > { %s225_s28 = sand.u32 (!%p219_p2), 1, %s682_s15   ;;  %s252_s30 = sand.u32 (!%p219_p2), 1, %s674_s13  }
  0x27   : > { %222 = sbr.rel (%p219_p2) target bundleno = 727 (0x2d7), region = 66  ;;  %s483_s5 = sshll.u32 (!%p219_p2), %s225_s28, 4 }
  0x28   : > { %s838_s6 = sshll.u32 (!%p219_p2), %s252_s30, 3  ;;  %p259_p3 = scmp.lt.s32.totalorder (!%p219_p2), %s690_s17, 1 }
  0x29   : > { %p263_p4 = scmp.eq.s32.totalorder (!%p219_p2), %s694_s18, 0  ;;  %p264_p5 = scmp.eq.s32.totalorder (!%p219_p2), %s690_s17, 0 }
  0x2a   : > { %s227_s26 = scalar_lea.vmem (!%p219_p2), [#allocation4], %s483_s5  ;;  %s254_s27 = scalar_lea.vmem (!%p219_p2), [#allocation5], %s838_s6 }
  0x2b   : > { %p265_p6 = pnand (!%p219_p2), %p264_p5, %p263_p4 }
  0x2c   : > { %s260_s10 = scalar_select %p259_p3, %s690_s17, 1 }
  0x2d   : > { %268 = sbr.rel (%p265_p6) target bundleno = 53 (0x35), region = 74 }
  0x2e   : > { %s261_s23 = scalar_lea.vmem %s912_s2, %s260_s10 }
  0x32   : > { %vm269_vm0 = vcmask 7168   ;;  %v708_v2 = vmov -inf   ;;  %v709_v3 = vmov 0.0  }
  0x33   : > { %270 = vst.msk [vmem:[#allocation2] sm:$0xff] %vm269_vm0, %v708_v2 }
  0x34   : > { %271 = vst.msk [vmem:[#allocation3] sm:$0xff] %vm269_vm0, %v709_v3 }
  0x35 PF: > { %v274_v4 = vld [vmem:[%s227_s26 + $0x8] sm:$0xff]  ;;  %v273_v5 = vld [vmem:[%s227_s26] sm:$0xff]  ;;  %s918_s0 = sld [smem:[#allocation8_spill]]  ;;  %vm279_vm1 = vcmask 130048   ;;  %p486_p7 = scmp.ne.s32.totalorder %s694_s18, 0 }
  0x36   : > { %297 = vmatpush.msra.mxu0 %v274_v4  ;;  %v583_v7 = vld [vmem:[%s261_s23] ss:$0 sm:$0xff] }
  0x38   : > { %298 = vmatpush.msra.mxu0 %v273_v5 }
  0x3b   : > { %v272_v6 = vld [vmem:[%s918_s0] sm:$0xff] }
  0x3c   : > { %485 = vmatmul.msk.f32.vlgmr.msra.gmra.mxu0 %vm279_vm1, %v272_v6 }
  0xb8   : > { %306 = sbr.rel (%p486_p7) target bundleno = 553 (0x229), region = 78 }
  0xb9   : > { %v300_v8 = vpop.f32.mrf.mxu0 }
  0xba   : > { %v301_v9 = vadd.f32 %v583_v7, %v300_v8 }
  0xbc   : > { %v303_v10 = vsub.f32 0.0, %v301_v9 }
  0xbd   : > { %v710_v11 = vmov 0   ;;  %v307_v12 = vld [vmem:[#allocation2] sm:$0xff]  ;;  %vm327_vm2 = vcmask 7168   ;;  %v311_v22 = vld [vmem:[#allocation3] sm:$0xff] }
  0xbe   : > { %308 = vmax.xlane.f32.xlu0 %v303_v10 }
  0xbf   : > { %584 = vset.pattern.permute.xlu0 %v710_v11 }
 0x131   : > { %v309_v13 = vpop.xlane.xlu0 %308 }
 0x132   : > { %v310_v14 = vmax.f32 %v307_v12, %v309_v13 }
 0x134   : > { %v312_v15 = vsub.f32 %v307_v12, %v310_v14  ;;  %329 = vst.msk [vmem:[#allocation2] sm:$0xff] %vm327_vm2, %v310_v14  ;;  %318 = vperm.xlu0 %584, %v310_v14  }
 0x136   : > { %v313_v20 = vmul.f32 1.442695, %v312_v15 }
 0x1a6   : > { %v319_v16 = vpop.permute.xlu0 %318 }
 0x1a7   : > { %v321_v17 = vsub.f32 %v303_v10, %v319_v16 }
 0x1a9   : > { %v322_v18 = vmul.f32 1.442695, %v321_v17 }
 0x1ab   : > { %585 = vpow2.f32 %v322_v18 }
 0x1ac   : > { %587 = vpow2.f32 %v313_v20 }
 0x1b1   : > { %v586_v19 = vpop.eup %585 }
 0x1b2   : > { %324 = vadd.xlane.f32.xlu1 %v586_v19  ;;  %v588_v21 = vpop.eup %587 }
 0x1b3   : > { %v315_v23 = vmul.f32 %v588_v21, %v311_v22 }
 0x225   : > { %v325_v24 = vpop.xlane.xlu1 %324 }
 0x226   : > { %v326_v25 = vadd.f32 %v325_v24, %v315_v23 }
 0x228   : > { %328 = vst.msk [vmem:[#allocation3] sm:$0xff] %vm327_vm2, %v326_v25 }
 0x229 PF: > { %p487_p8 = scmp.ne.s32.totalorder %s694_s18, 1 }
 0x22b   : > { %333 = sbr.rel (%p487_p8) target bundleno = 710 (0x2c6), region = 82 }
 0x230   : > { %v335_v26 = vld [vmem:[#allocation3] sm:$0xff]  ;;  %v711_v27 = vmov 0   ;;  %v334_v29 = vld [vmem:[#allocation2] sm:$0xff] }
 0x231   : > { %589 = vset.pattern.permute.xlu0 %v711_v27  ;;  %590 = vlog2.f32 %v335_v26 }
 0x237   : > { %v591_v28 = vpop.eup %590 }
 0x238   : > { %v337_v30 = vmul.f32 0.6931472, %v591_v28 }
 0x23a   : > { %v338_v31 = vadd.f32 %v337_v30, %v334_v29 }
 0x23c   : > { %341 = vperm.xlu0 %589, %v338_v31  }
 0x2ae   : > { %v342_v32 = vpop.permute.xlu0 %341 }
 0x2af   : > { %v344_v33 = vsub.f32 %v303_v10, %v342_v32 }
 0x2b1   : > { %v345_v34 = vmul.f32 1.442695, %v344_v33 }
 0x2b3   : > { %592 = vpow2.f32 %v345_v34 }
 0x2b9   : > { %v593_v35 = vpop.eup %592 }
 0x2ba   : > { %v347_v36 = vadd.f32 0.0001, %v593_v35 }
 0x2bc   : > { %594 = vlog2.f32 %v347_v36 }
 0x2c2   : > { %v595_v37 = vpop.eup %594 }
 0x2c3   : > { %v349_v38 = vmul.f32 0.6931472, %v595_v37 }
 0x2c5   : > { %350 = vst [vmem:[%s254_s27] sm:$0xff] %v349_v38 }
 0x2c6 PF: > { %s359_s28 = smul.u32 %s690_s17, %s694_s18  ;;  %s367_s5 = sshll.u32 %s254_s27, 4  ;;  %s368_s5 = int_to_ptr.vmem [resolvable:$true] %s367_s5 }
 0x2c7   : > { %s352_s15 = scalar_lea.sflag [#allocation6], %s252_s30  ;;  %s616_s6 = scalar_lea.hbm %s913_s3, 16 }
 0x2c8   : > { %s489_s10 = sshll.u32 %s359_s28, 3 }
 0x2c9   : > { %s365_s23 = scalar_lea.hbm %s913_s3, %s489_s10 }
 0x2ca   : > { %s369_s26 = sshll.u32 %s365_s23, 4  ;;  %s370_s26 = int_to_ptr.hbm [resolvable:$true] %s369_s26 }
 0x2cb   : > { %s610_s29 = sshra.s32 %s370_s26, 4  ;;  %s611_s29 = int_to_ptr.hbm [resolvable:$true] %s610_s29 }
 0x2cc   : > { %s612_s0 = scalar_lea.hbm %s611_s29, 8  ;;  %p617_p0 = scmp.lt.s32.totalorder %s611_s29, %s913_s3 }
 0x2cd   : > { %p613_p9 = scmp.ne.s32.totalorder %s611_s29, %s612_s0  ;;  %p618_p1 = scmp.lt.s32.totalorder %s616_s6, %s612_s0 }
 0x2cf   : > { %p614_p10 = pnand %p613_p9, %p813_p11  ;;  %p619_p2 = por %p618_p1, %p617_p0 }
 0x2d1   : > { %p615_p13 = pneg %p614_p10 }
 0x2d3   : > { %p620_p3 = pnand %p619_p2, %p615_p13 }
 0x2d5   : > { %623 = shalt.err (!%p620_p3)
}
 0x2d6   : > { %492 = dma.vmem_to_hbm [thread:$0]  (%p813_p11), %s368_s5, 128, %s370_s26, %s352_s15  }
 0x2d7 PF: > { %p498_p4 = scmp.ge.s32.totalorder %s706_s21, 2  ;;  %s381_s30 = sand.u32 1, %s670_s12  }
 0x2d8   : > { %s382_s10 = scalar_lea.sflag [#allocation6], %s381_s30 }
 0x2d9   : > { %p495_p5 = pnand %p498_p4, %p817_p12 }
 0x2db   : > { %p496_p6 = pneg %p495_p5 }
 0x2dd   : > { %665 = dma.done.wait (%p496_p6), %s382_s10, 128  }
 0x2de   : > { %667 = vsyncadd (%p496_p6), %s382_s10, 4294967168  ;;  %s16_s21 = sadd.s32 1, %s706_s21   ;;  %s919_s12 = smov %s674_s13 }
 0x2df   : > { %p13_p7 = scmp.ge.s32.totalorder %s16_s21, 6   ;;  %s920_s13 = smov %s678_s14 }
 0x2e0   : > { %s921_s14 = smov %s822_s9  ;;  %s922_s15 = smov %s686_s16 }
 0x2e1   : > { %s923_s16 = smov %s805_s4  ;;  %s924_s17 = smov %s698_s19 }
 0x2e2   : > { %s925_s18 = smov %s702_s20  ;;  %s926_s19 = smov %s929_s24 }
 0x2e3   : > { %s927_s20 = smov %s933_s25  ;;  %15 = sbr.rel (!%p13_p7) target bundleno = 8 (0x8), region = 128 }
 0x2e8   :  { %388 = vsyncpa [#allocation6], 1 }
 0x2e9   :  { %390 = vsyncpa [#allocation6 + $0x1], 1 }

// kernel: vae_bow_forward.2
= control target key start
LH: loop header
LB: loop body
LE: loop exit
PB: predicated region body
PF: predicated region fallthrough
CT: control target
= control target key end

     0   :  { %s1196_s0 = inlined_call_operand.vmem [shape: f32[8,256], index: 0, kind: input, shape index: {}]   ;;  %s1197_s1 = inlined_call_operand.vmem [shape: f32[256,64], index: 1, kind: input, shape index: {}]   ;;  %s1198_s2 = inlined_call_operand.vmem [shape: f32[1,64], index: 2, kind: input, shape index: {}]   ;;  %s1199_s3 = inlined_call_operand.vmem [shape: f32[64,32], index: 3, kind: input, shape index: {}]   ;;  %s1200_s4 = inlined_call_operand.vmem [shape: f32[1,32], index: 4, kind: input, shape index: {}]   ;;  %s1201_s5 = inlined_call_operand.vmem [shape: f32[32,32], index: 5, kind: input, shape index: {}]   ;;  %s1202_s6 = inlined_call_operand.vmem [shape: f32[1,32], index: 6, kind: input, shape index: {}]   ;;  %s1203_s7 = inlined_call_operand.vmem [shape: f32[8,16], index: 7, kind: input, shape index: {}]   ;;  %s1204_s8 = inlined_call_operand.vmem [shape: f32[8,16], index: 8, kind: output, shape index: {0}]   ;;  %s1205_s9 = inlined_call_operand.vmem [shape: f32[8,1], index: 9, kind: output, shape index: {1}]   ;;  %s1206_s10 = inlined_call_operand.hbm [shape: f32[8,256], index: 10, kind: output, shape index: {2}]  }
   0x1   :  { %1210 = sst [smem:[#allocation8_spill]] %s1196_s0 }
   0x2   :  { %1211 = sst [smem:[#allocation9_spill]] %s1197_s1 }
   0x3   :  { %16 = vsyncpa [#allocation4], 0 }
   0x4   :  { %18 = vsyncpa [#allocation4 + $0x1], 0  ;;  %s1008_s13 = smov 0   ;;  %s1010_s14 = smov 0  }
   0x5   :  { %s1012_s15 = smov 0   ;;  %s1014_s16 = smov 0  }
   0x6   :  { %s1016_s17 = smov 0   ;;  %s1018_s18 = smov 0  }
   0x7 LB: > { %1212 = sst [smem:[#allocation6_spill]] %s943_s17  ;;  %s780_s19 = sadd.s32 4294967295, %s947_s18   ;;  %s947_s18 = sphi %s1018_s18, %s24_s18   ;;  %s943_s17 = sphi %s1016_s17, %s1220_s17   ;;  %s939_s16 = sphi %s1014_s16, %s1219_s16   ;;  %s935_s15 = sphi %s1012_s15, %s1223_s15   ;;  %s931_s14 = sphi %s1010_s14, %s1222_s14   ;;  %s927_s13 = sphi %s1008_s13, %s1221_s13  }
   0x8   : > { %s781_s20 = sadd.s32 4294967294, %s947_s18   ;;  %s33_s21 = sadd.s32 1, %s943_s17 }
   0x9   : > { %s282_s22 = sadd.s32 1, %s935_s15  ;;  %p34_p0 = scmp.ge.s32.totalorder %s33_s21, 2 }
   0xa   : > { %p292_p1 = scmp.ne.s32.totalorder %s935_s15, %s931_s14  ;;  %p293_p2 = scmp.eq.s32.totalorder %s780_s19, 1 }
   0xb   : > { %p298_p3 = scmp.ne.s32.totalorder %s931_s14, %s927_s13  ;;  %s1225_s21 = smov (%p34_p0, %s33_s21), 0 }
   0xc   : > { %1213 = sst [smem:[#allocation7_spill]] %s1225_s21  ;;  %p1048_p4 = por %p293_p2, %p292_p1 }
   0xd   : > { %p299_p5 = scmp.eq.s32.totalorder %s781_s20, 1  ;;  %s278_s24 = ssub.s32 %s943_s17, %s1225_s21 }
   0xe   : > { %p785_p6 = scmp.ge.s32.totalorder %s947_s18, 1  ;;  %p280_p7 = scmp.eq.s32.totalorder %s278_s24, 0 }
   0xf   : > { %p1055_p8 = por %p299_p5, %p298_p3  ;;  %p359_p9 = scmp.lt.s32.totalorder %s947_s18, 3 }
  0x10   : > { %s1061_s26 = scalar_select %p280_p7, %s935_s15, %s282_s22  }
  0x11   : > { %p360_p10 = pnand %p785_p6, %p359_p9 }
  0x12   : > { %s1209_s27 = sand.u32 (!%p360_p10), 1, %s931_s14   ;;  %p419_p11 = scmp.lt.s32.totalorder (!%p360_p10), %s939_s16, 1 }
  0x13   : > { %363 = sbr.rel (%p360_p10) target bundleno = 847 (0x34f), region = 52  ;;  %s788_s28 = sshll.u32 (!%p360_p10), %s939_s16, 4 }
  0x14   : > { %s1068_s29 = sshll.u32 (!%p360_p10), %s1209_s27, 3  ;;  %p426_p12 = scmp.lt.s32.totalorder (!%p360_p10), %s788_s28, 31 }
  0x15   : > { %s1216_s0 = sld [smem:[#allocation8_spill]] (!%p360_p10)  ;;  %s416_s27 = scalar_lea.vmem (!%p360_p10), [#allocation3], %s1068_s29 }
  0x16   : > { %s1217_s1 = sld [smem:[#allocation9_spill]] (!%p360_p10)  ;;  %p791_p13 = scmp.ne.s32.totalorder (!%p360_p10), %s939_s16, 0 }
  0x18   : > { %s420_s30 = scalar_select %p419_p11, %s939_s16, 1  ;;  %v949_v1 = vmov 0.0  }
  0x19   : > { %s1227_s28 = smov (!%p426_p12, %s788_s28), 31 }
  0x1a   : > { %s787_s11 = sshll.u32 %s420_s30, 3  ;;  %s789_s22 = sshll.u32 %s1227_s28, 3 }
  0x1b   : > { %s424_s20 = scalar_lea.vmem %s1216_s0, %s787_s11  ;;  %451 = sbr.rel (%p791_p13) target bundleno = 34 (0x22), region = 56 }
  0x1c   : > { %s1077_s17 = scalar_lea.vmem %s1217_s1, %s789_s22  ;;  %v443_v0 = vld [vmem:[%s424_s20] sm:$0xff] }
  0x1d   : > { %vm444_vm0 = vcmp.gt.f32.partialorder %v443_v0, 0.0 }
  0x1e   : > { %v790_v2 = vsel %vm444_vm0, 1.0, %v949_v1 }
  0x1f   : > { %447 = vst [vmem:[%s416_s27] sm:$0xff] %v790_v2 }
  0x20   : > { %vm452_vm1 = vcmask 523264   ;;  %v950_v3 = vmov 0.0  }
  0x21   : > { %453 = vst.msk [vmem:[#allocation2] sm:$0xff] %vm452_vm1, %v950_v3 }
  0x22 PF: > { %v470_v4 = vld [vmem:[%s1077_s17 + $0x78] sm:$0xff]  ;;  %v469_v5 = vld [vmem:[%s1077_s17 + $0x70] sm:$0xff]  ;;  %v468_v6 = vld [vmem:[%s1077_s17 + $0x68] sm:$0xff]  ;;  %vm492_vm2 = vcmask 523264   ;;  %p792_p0 = scmp.ne.s32.totalorder %s939_s16, 1 }
  0x23   : > { %471 = vmatpush.msra.mxu0 %v470_v4  ;;  %v467_v7 = vld [vmem:[%s1077_s17 + $0x60] sm:$0xff]  ;;  %v466_v8 = vld [vmem:[%s1077_s17 + $0x58] sm:$0xff]  ;;  %v465_v9 = vld [vmem:[%s1077_s17 + $0x50] sm:$0xff]  ;;  %s951_s21 = smov (!%p792_p0), 16   ;;  %s952_s28 = smov (!%p792_p0), 112  }
  0x24   : > { %v464_v10 = vld [vmem:[%s1077_s17 + $0x48] sm:$0xff]  ;;  %v463_v11 = vld [vmem:[%s1077_s17 + $0x40] sm:$0xff]  ;;  %v462_v12 = vld [vmem:[%s1077_s17 + $0x38] sm:$0xff] }
  0x25   : > { %472 = vmatpush.msra.mxu0 %v469_v5  ;;  %v461_v13 = vld [vmem:[%s1077_s17 + $0x30] sm:$0xff]  ;;  %v460_v14 = vld [vmem:[%s1077_s17 + $0x28] sm:$0xff]  ;;  %v459_v15 = vld [vmem:[%s1077_s17 + $0x20] sm:$0xff] }
  0x26   : > { %v458_v16 = vld [vmem:[%s1077_s17 + $0x18] sm:$0xff]  ;;  %v457_v17 = vld [vmem:[%s1077_s17 + $0x10] sm:$0xff]  ;;  %v456_v18 = vld [vmem:[%s1077_s17 + $0x8] sm:$0xff] }
  0x27   : > { %473 = vmatpush.msra.mxu0 %v468_v6  ;;  %v455_v19 = vld [vmem:[%s1077_s17] sm:$0xff] }
  0x28   : > { %v454_v20 = vld [vmem:[#allocation2] sm:$0xff] }
  0x29   : > { %474 = vmatpush.msra.mxu0 %v467_v7 }
  0x2b   : > { %475 = vmatpush.msra.mxu0 %v466_v8 }
  0x2d   : > { %476 = vmatpush.msra.mxu0 %v465_v9 }
  0x2f   : > { %477 = vmatpush.msra.mxu0 %v464_v10 }
  0x31   : > { %478 = vmatpush.msra.mxu0 %v463_v11 }
  0x33   : > { %479 = vmatpush.msra.mxu0 %v462_v12 }
  0x35   : > { %480 = vmatpush.msra.mxu0 %v461_v13 }
  0x37   : > { %481 = vmatpush.msra.mxu0 %v460_v14 }
  0x39   : > { %482 = vmatpush.msra.mxu0 %v459_v15 }
  0x3b   : > { %483 = vmatpush.msra.mxu0 %v458_v16 }
  0x3d   : > { %484 = vmatpush.msra.mxu0 %v457_v17 }
  0x3f   : > { %485 = vmatpush.msra.mxu0 %v456_v18 }
  0x41   : > { %486 = vmatpush.msra.mxu0 %v455_v19 }
  0x42   : > { %487 = vmatmul.f32.vlgmr.msra.gmra.mxu0 %v443_v0 }
  0xbe   : > { %497 = sbr.rel (%p792_p0) target bundleno = 832 (0x340), region = 60 }
  0xbf   : > { %v488_v21 = vpop.f32.mrf.mxu0 }
  0xc0   : > { %v491_v22 = vadd.f32 %v488_v21, %v454_v20 }
  0xc2   : > { %493 = vst.msk [vmem:[#allocation2] sm:$0xff] %vm492_vm2, %v491_v22 }
  0xc3   : > { %v512_v23 = vld [vmem:[%s1199_s3 + $0x38] sm:$0xff]  ;;  %v511_v24 = vld [vmem:[%s1199_s3 + $0x30] sm:$0xff]  ;;  %v510_v25 = vld [vmem:[%s1199_s3 + $0x28] sm:$0xff]  ;;  %vm549_vm3 = vcmask 261120   ;;  %vm583_vm4 = vcmask 130048   ;;  %vm602_vm5 = vcmask 7168  }
  0xc4   : > { %528 = vmatpush.msra.mxu0 %v512_v23  ;;  %v860_v27 = vld [vmem:[%s1198_s2] ss:$0 sm:$0xff]  ;;  %v508_v30 = vld [vmem:[%s1199_s3 + $0x18] sm:$0xff]  ;;  %v507_v31 = vld [vmem:[%s1199_s3 + $0x10] sm:$0xff] }
  0xc5   : > { %v509_v28 = vld [vmem:[%s1199_s3 + $0x20] sm:$0xff]  ;;  %v506_v32 = vld [vmem:[%s1199_s3 + $0x8] sm:$0xff]  ;;  %v544_v35 = vld [vmem:[%s1201_s5 + $0x18] sm:$0xff] }
  0xc6   : > { %529 = vmatpush.msra.mxu0 %v511_v24  ;;  %v505_v33 = vld [vmem:[%s1199_s3] sm:$0xff]  ;;  %565 = vmatpush.msra.mxu1 %v544_v35  ;;  %v543_v36 = vld [vmem:[%s1201_s5 + $0x10] sm:$0xff]  ;;  %v542_v37 = vld [vmem:[%s1201_s5 + $0x8] sm:$0xff] }
  0xc7   : > { %v541_v38 = vld [vmem:[%s1201_s5] sm:$0xff] }
  0xc8   : > { %530 = vmatpush.msra.mxu0 %v510_v25  ;;  %566 = vmatpush.msra.mxu1 %v543_v36  ;;  %v861_v39 = vld [vmem:[%s1200_s4] ss:$0 sm:$0xff] }
  0xc9   : > { %v498_v26 = vld [vmem:[#allocation2] sm:$0xff] }
  0xca   : > { %v503_v29 = vadd.f32 %v860_v27, %v498_v26  ;;  %531 = vmatpush.msra.mxu0 %v509_v28  ;;  %567 = vmatpush.msra.mxu1 %v542_v37  ;;  %v862_v43 = vld [vmem:[%s1202_s6] ss:$0 sm:$0xff] }
  0xcb   : > { %v576_v55 = vld [vmem:[%s1203_s7] sm:$0xff] }
  0xcc   : > { %863 = vtanh.f32 %v503_v29  ;;  %532 = vmatpush.msra.mxu0 %v508_v30  ;;  %568 = vmatpush.msra.mxu1 %v541_v38 }
  0xce   : > { %533 = vmatpush.msra.mxu0 %v507_v31 }
  0xd0   : > { %534 = vmatpush.msra.mxu0 %v506_v32 }
  0xd2   : > { %v864_v34 = vpop.eup %863  ;;  %535 = vmatpush.msra.mxu0 %v505_v33 }
  0xd3   : > { %793 = vmatmul.msk.f32.vlgmr.msra.gmra.mxu0 %vm492_vm2, %v864_v34 }
 0x150   : > { %v537_v40 = vpop.f32.mrf.mxu0 }
 0x151   : > { %v538_v41 = vadd.f32 %v861_v39, %v537_v40 }
 0x153   : > { %865 = vtanh.f32 %v538_v41 }
 0x159   : > { %v866_v42 = vpop.eup %865 }
 0x15a   : > { %794 = vmatmul.msk.f32.vlgmr.msra.gmra.mxu1 %vm549_vm3, %v866_v42 }
 0x1d7   : > { %v570_v44 = vpop.f32.mrf.mxu1 }
 0x1d8   : > { %v571_v45 = vadd.f32 %v862_v43, %v570_v44 }
 0x1da   : > { %v586_v46 = vmul.f32 %v571_v45, %v571_v45  ;;  %v573_v47 = vmul.f32 0.5, %v571_v45 }
 0x1dc   : > { %588 = vrot.lane.b32.xlu0 %v586_v46, %s951_s21  ;;  %v574_v48 = vmul.f32 1.442695, %v573_v47 }
 0x1de   : > { %867 = vpow2.f32 %v574_v48 }
 0x1e4   : > { %v868_v49 = vpop.eup %867 }
 0x1e5   : > { %578 = vrot.lane.b32.xlu1 %v868_v49, %s952_s28  ;;  %v585_v51 = vmul.f32 %v868_v49, %v868_v49 }
 0x24e   : > { %v589_v50 = vpop.permute.xlu0 %588 }
 0x24f   : > { %v591_v52 = vsub.f32 %v571_v45, %v589_v50 }
 0x251   : > { %v592_v53 = vsub.f32 %v591_v52, %v585_v51 }
 0x253   : > { %v593_v54 = vadd.f32 1.0, %v592_v53 }
 0x255   : > { %595 = vrot.lane.b32.xlu0 %v593_v54, %s952_s28 }
 0x257   : > { %v579_v56 = vpop.permute.xlu1 %578 }
 0x258   : > { %v581_v57 = vmul.f32 %v579_v56, %v576_v55 }
 0x25a   : > { %v582_v58 = vadd.f32 %v581_v57, %v571_v45 }
 0x25c   : > { %584 = vst.msk [vmem:[%s1204_s8] sm:$0xff] %vm583_vm4, %v582_v58 }
 0x2c7   : > { %v596_v59 = vpop.permute.xlu0 %595 }
 0x2c8   : > { %v598_v60 = vsel %vm583_vm4, %v596_v59, 0.0 }
 0x2c9   : > { %599 = vadd.xlane.f32.xlu1 %v598_v60 }
 0x33c   : > { %v600_v61 = vpop.xlane.xlu1 %599 }
 0x33d   : > { %v601_v62 = vmul.f32 -0.5, %v600_v61 }
 0x33f   : > { %603 = vst.msk [vmem:[%s1205_s9] sm:$0xff] %vm602_vm5, %v601_v62 }
 0x340 PF: > { %s796_s22 = sshll.u32 %s939_s16, 3  ;;  %s633_s30 = sshll.u32 %s416_s27, 4  ;;  %s634_s30 = int_to_ptr.vmem [resolvable:$true] %s633_s30 }
 0x341   : > { %s631_s28 = scalar_lea.hbm %s1206_s10, %s796_s22  ;;  %s1218_s17 = sand.u32 1, %s931_s14  }
 0x342   : > { %s635_s11 = sshll.u32 %s631_s28, 4  ;;  %s613_s12 = scalar_lea.sflag [#allocation4], %s1218_s17  ;;  %s636_s11 = int_to_ptr.hbm [resolvable:$true] %s635_s11 }
 0x343   : > { %s883_s0 = sshra.s32 %s636_s11, 4  ;;  %s889_s1 = scalar_lea.hbm %s1206_s10, 16  ;;  %s884_s0 = int_to_ptr.hbm [resolvable:$true] %s883_s0 }
 0x344   : > { %s885_s19 = scalar_lea.hbm %s884_s0, 8  ;;  %p890_p5 = scmp.lt.s32.totalorder %s884_s0, %s1206_s10 }
 0x345   : > { %p886_p1 = scmp.ne.s32.totalorder %s884_s0, %s885_s19  ;;  %p891_p6 = scmp.lt.s32.totalorder %s889_s1, %s885_s19 }
 0x347   : > { %p887_p2 = pnand %p886_p1, %p1048_p4  ;;  %p892_p7 = por %p891_p6, %p890_p5 }
 0x349   : > { %p888_p3 = pneg %p887_p2 }
 0x34b   : > { %p893_p9 = pnand %p892_p7, %p888_p3 }
 0x34d   : > { %896 = shalt.err (!%p893_p9)
}
 0x34e   : > { %801 = dma.vmem_to_hbm [thread:$0]  (%p1048_p4), %s634_s30, 128, %s636_s11, %s613_s12  }
 0x34f PF: > { %p807_p10 = scmp.ge.s32.totalorder %s947_s18, 2  ;;  %s661_s27 = sand.u32 1, %s927_s13  }
 0x350   : > { %s662_s29 = scalar_lea.sflag [#allocation4], %s661_s27 }
 0x351   : > { %p804_p11 = pnand %p807_p10, %p1055_p8 }
 0x353   : > { %p805_p12 = pneg %p804_p11 }
 0x355   : > { %922 = dma.done.wait (%p805_p12), %s662_s29, 128  }
 0x356   : > { %924 = vsyncadd (%p805_p12), %s662_s29, 4294967168  ;;  %s24_s18 = sadd.s32 1, %s947_s18   ;;  %s1219_s16 = sld [smem:[#allocation6_spill]] }
 0x357   : > { %p21_p13 = scmp.ge.s32.totalorder %s24_s18, 4   ;;  %s1220_s17 = sld [smem:[#allocation7_spill]] }
 0x358   : > { %s1221_s13 = smov %s931_s14  ;;  %s1222_s14 = smov %s935_s15 }
 0x359   : > { %s1223_s15 = smov %s1061_s26  ;;  %23 = sbr.rel (!%p21_p13) target bundleno = 7 (0x7), region = 125 }
 0x35e   :  { %668 = vsyncpa [#allocation4], 1 }
 0x35f   :  { %670 = vsyncpa [#allocation4 + $0x1], 1 }

</bundles_post_ra>
